<compile_context>
chip_gen: v7x
topology: tpu7x:2x2x1
jax: 0.10.0
libtpu: 0.0.40
codegen_flags: <defaults>
</compile_context>

<pallas_src>
import jax
import jax.numpy as jnp
from jax.experimental import pallas as pl
from jax.experimental.pallas import tpu as pltpu

# ----------------------------- config ---------------------------------------
BATCH = 8          # cfg.vicreg.batch_size (small, synthetic)
AUDIO_DIM = 16     # raw audio feature dim (backbone input)   — 8-aligned
PARAM_DIM = 24     # raw params feature dim (backbone input)  — 8-aligned
REPR_DIM = 32      # cfg.dim  (backbone output / projector input)
HIDDEN = 64        # hidden width from cfg.vicreg.mlp spec "64-64-%d"
EMBED_DIM = 32     # cfg.embeddim (projector output)
BN_EPS = 1e-5

# Row offsets into the single packed constant slab (width = HIDDEN = 64).
_R_WA0, _R_WA1 = 0, AUDIO_DIM                    # folded audio backbone  (16, 64)
_R_WP0, _R_WP1 = _R_WA1, _R_WA1 + PARAM_DIM      # folded param backbone  (24, 64)
_R_W20, _R_W21 = _R_WP1, _R_WP1 + HIDDEN         # projector layer 2      (64, 64)
_R_W30, _R_W31 = _R_W21, _R_W21 + HIDDEN         # projector layer 3      (64, 64), cols 0:EMBED valid
_R_BN0, _R_BN1 = _R_W31, _R_W31 + 4              # g1 / be1 / g2 / be2    (4, 64)
_SLAB_ROWS = ((_R_BN1 + 7) // 8) * 8             # pad rows to a multiple of 8 -> 176


# ----------------------------- Pallas kernel --------------------------------
def _bn_relu_per_branch(h, gamma, beta):
    """Training-mode BatchNorm1d per branch (one-pass variance) + ReLU.

    `h` is the row-stacked [audio; param] activation (2B, H); statistics are
    computed separately over each B-row half (matching two separate
    projector(...) calls), then applied as a fused scale/shift.
    """
    def _scale_shift(x):
        mu = jnp.mean(x, axis=0, keepdims=True)
        ex2 = jnp.mean(x * x, axis=0, keepdims=True)   # independent reduction; pipelines with mu
        var = ex2 - mu * mu                            # biased batch variance, one pass
        s = gamma * jax.lax.rsqrt(var + BN_EPS)        # (1, H)
        return x * s + (beta - s * mu)                 # one mul + one add per element
    ha = _scale_shift(h[0:BATCH, :])
    hp = _scale_shift(h[BATCH:2 * BATCH, :])
    return jnp.maximum(jnp.concatenate([ha, hp], axis=0), 0.0)


def vicreg_fused_kernel(audio_ref, param_ref, w_ref, o_ref):
    """Folded backbone+projector layer 1 (per branch) + shared layers 2/3 on the
    row-stacked (2B, .) activation.  All constants come from one VMEM slab."""
    # --- unpack the single constant slab with static slices ------------------
    waf = w_ref[_R_WA0:_R_WA1, :]                       # (AUDIO_DIM, HIDDEN)
    wpf = w_ref[_R_WP0:_R_WP1, :]                       # (PARAM_DIM, HIDDEN)
    w2 = w_ref[_R_W20:_R_W21, :]                        # (HIDDEN, HIDDEN)
    w3 = w_ref[_R_W30:_R_W31, :][:, 0:EMBED_DIM]        # (HIDDEN, EMBED_DIM)
    bn = w_ref[_R_BN0:_R_BN1, :]                        # (4, HIDDEN)
    g1, be1, g2, be2 = bn[0:1, :], bn[1:2, :], bn[2:3, :], bn[3:4, :]

    # --- layer 1: backbone Linear folded into projector Linear ---------------
    # (all constant-in-batch biases cancel exactly under training-mode BN)
    ha = jnp.dot(audio_ref[...], waf, preferred_element_type=jnp.float32)
    hp = jnp.dot(param_ref[...], wpf, preferred_element_type=jnp.float32)
    h = jnp.concatenate([ha, hp], axis=0)               # (2B, HIDDEN) row-stacked

    # --- BN+ReLU (per-branch stats), layer 2, BN+ReLU, layer 3 ---------------
    h = _bn_relu_per_branch(h, g1, be1)
    h = jnp.dot(h, w2, preferred_element_type=jnp.float32)
    h = _bn_relu_per_branch(h, g2, be2)
    o_ref[...] = jnp.dot(h, w3, preferred_element_type=jnp.float32)   # single store


def vicreg_forward(audio, params_in, p):
    """Full VICReg forward (both branches) in one gridless pallas_call."""
    B = audio.shape[0]
    vmem = pl.BlockSpec(memory_space=pltpu.MemorySpace.VMEM)
    out = pl.pallas_call(
        vicreg_fused_kernel,
        out_shape=jax.ShapeDtypeStruct((2 * B, EMBED_DIM), jnp.float32),
        in_specs=[vmem, vmem, vmem],
        out_specs=vmem,
    )(audio, params_in, p["slab"])
    return out[:B], out[B:]


# ----------------------------- parameter init -------------------------------
def _linear_init(key, fan_in, fan_out, bias=True):
    """PyTorch nn.Linear default init, weight returned as [in, out]."""
    kw, kb = jax.random.split(key)
    bound = 1.0 / jnp.sqrt(float(fan_in))
    w = jax.random.uniform(kw, (fan_in, fan_out), jnp.float32, -bound, bound)
    if not bias:
        return w, None
    b = jax.random.uniform(kb, (1, fan_out), jnp.float32, -bound, bound)
    return w, b


def init_vicreg_params(key):
    ks = jax.random.split(key, 5)
    # external backbones, modeled as linear encoders
    wa, ba = _linear_init(ks[0], AUDIO_DIM, REPR_DIM)
    wp, bp = _linear_init(ks[1], PARAM_DIM, REPR_DIM)
    # projector layers
    w1, b1 = _linear_init(ks[2], REPR_DIM, HIDDEN)
    w2, b2 = _linear_init(ks[3], HIDDEN, HIDDEN)
    w3, _ = _linear_init(ks[4], HIDDEN, EMBED_DIM, bias=False)
    g1 = jnp.ones((1, HIDDEN), jnp.float32)
    be1 = jnp.zeros((1, HIDDEN), jnp.float32)
    g2 = jnp.ones((1, HIDDEN), jnp.float32)
    be2 = jnp.zeros((1, HIDDEN), jnp.float32)

    # Fold the backbone Linears into the projector's first layer (host-side,
    # once).  Biases are intentionally omitted: they cancel under training BN.
    waf = wa @ w1                                        # (AUDIO_DIM, HIDDEN)
    wpf = wp @ w1                                        # (PARAM_DIM, HIDDEN)

    # Pack all kernel constants into one (176, 64) slab -> a single input DMA.
    slab = jnp.zeros((_SLAB_ROWS, HIDDEN), jnp.float32)
    slab = slab.at[_R_WA0:_R_WA1, :].set(waf)
    slab = slab.at[_R_WP0:_R_WP1, :].set(wpf)
    slab = slab.at[_R_W20:_R_W21, :].set(w2)
    slab = slab.at[_R_W30:_R_W31, 0:EMBED_DIM].set(w3)
    slab = slab.at[_R_BN0:_R_BN1, :].set(jnp.concatenate([g1, be1, g2, be2], axis=0))

    return {
        # unpacked (used by the pure-JAX reference, which keeps every bias)
        "wa": wa, "ba": ba, "wp": wp, "bp": bp,
        "w1": w1, "b1": b1, "w2": w2, "b2": b2, "w3": w3,
        "g1": g1, "be1": be1, "g2": g2, "be2": be2,
        # packed kernel input
        "slab": slab,
    }


# ----------------------------- pure-JAX reference ----------------------------
def _projector_ref(x, p):
    h = x @ p["w1"] + p["b1"]
    mu = h.mean(0, keepdims=True)
    var = ((h - mu) ** 2).mean(0, keepdims=True)
    h = jnp.maximum(p["g1"] * (h - mu) * jax.lax.rsqrt(var + BN_EPS) + p["be1"], 0.0)
    h = h @ p["w2"] + p["b2"]
    mu = h.mean(0, keepdims=True)
    var = ((h - mu) ** 2).mean(0, keepdims=True)
    h = jnp.maximum(p["g2"] * (h - mu) * jax.lax.rsqrt(var + BN_EPS) + p["be2"], 0.0)
    return h @ p["w3"]


def _vicreg_forward_ref(audio, params_in, p):
    ra = audio @ p["wa"] + p["ba"]
    rp = params_in @ p["wp"] + p["bp"]
    return _projector_ref(ra, p), _projector_ref(rp, p)


# ----------------------------- main ------------------------------------------
if __name__ == "__main__":
    key = jax.random.PRNGKey(0)
    k_audio, k_param, k_init = jax.random.split(key, 3)

    audio = jax.random.normal(k_audio, (BATCH, AUDIO_DIM), jnp.float32)
    params_in = jax.random.normal(k_param, (BATCH, PARAM_DIM), jnp.float32)

    p = init_vicreg_params(k_init)

    x, y = vicreg_forward(audio, params_in, p)
    x = jax.block_until_ready(x)
    y = jax.block_until_ready(y)

    # correctness check vs. pure-JAX reference (the reference keeps all biases;
    # they cancel under training-mode BN, so results match to fp rounding)
    x_ref, y_ref = _vicreg_forward_ref(audio, params_in, p)
    assert x.shape == (BATCH, EMBED_DIM) and y.shape == (BATCH, EMBED_DIM)
    assert jnp.allclose(x, x_ref, atol=1e-4, rtol=1e-4)
    assert jnp.allclose(y, y_ref, atol=1e-4, rtol=1e-4)

    print("KERNEL_OK")
</pallas_src>

<mosaic_0001>
module attributes {stable_mosaic.version = 11 : i64} {
  func.func @vicreg_fused_kernel(%arg0: memref<8x16xf32, #tpu.memory_space<vmem>>, %arg1: memref<8x24xf32, #tpu.memory_space<vmem>>, %arg2: memref<176x64xf32, #tpu.memory_space<vmem>>, %arg3: memref<16x32xf32, #tpu.memory_space<vmem>>) attributes {dimension_semantics = [], scalar_prefetch = 0 : i64, scratch_operands = 0 : i64, tpu.core_type = #tpu.core_type<tc>} {
    %c0 = arith.constant 0 : index
    %c0_0 = arith.constant 0 : index
    %0 = vector.load %arg2[%c0, %c0_0] : memref<176x64xf32, #tpu.memory_space<vmem>>, vector<16x64xf32>
    %c16 = arith.constant 16 : index
    %c0_1 = arith.constant 0 : index
    %1 = vector.load %arg2[%c16, %c0_1] : memref<176x64xf32, #tpu.memory_space<vmem>>, vector<24x64xf32>
    %c40 = arith.constant 40 : index
    %c0_2 = arith.constant 0 : index
    %2 = vector.load %arg2[%c40, %c0_2] : memref<176x64xf32, #tpu.memory_space<vmem>>, vector<64x64xf32>
    %c104 = arith.constant 104 : index
    %c0_3 = arith.constant 0 : index
    %3 = vector.load %arg2[%c104, %c0_3] : memref<176x64xf32, #tpu.memory_space<vmem>>, vector<64x64xf32>
    %4 = vector.extract_strided_slice %3 {offsets = [0, 0], sizes = [64, 32], strides = [1, 1]} : vector<64x64xf32> to vector<64x32xf32>
    %c168 = arith.constant 168 : index
    %c0_4 = arith.constant 0 : index
    %5 = vector.load %arg2[%c168, %c0_4] : memref<176x64xf32, #tpu.memory_space<vmem>>, vector<4x64xf32>
    %6 = vector.extract_strided_slice %5 {offsets = [0, 0], sizes = [1, 64], strides = [1, 1]} : vector<4x64xf32> to vector<1x64xf32>
    %7 = vector.extract_strided_slice %5 {offsets = [1, 0], sizes = [1, 64], strides = [1, 1]} : vector<4x64xf32> to vector<1x64xf32>
    %8 = vector.extract_strided_slice %5 {offsets = [2, 0], sizes = [1, 64], strides = [1, 1]} : vector<4x64xf32> to vector<1x64xf32>
    %9 = vector.extract_strided_slice %5 {offsets = [3, 0], sizes = [1, 64], strides = [1, 1]} : vector<4x64xf32> to vector<1x64xf32>
    %c0_5 = arith.constant 0 : index
    %c0_6 = arith.constant 0 : index
    %10 = vector.load %arg0[%c0_5, %c0_6] : memref<8x16xf32, #tpu.memory_space<vmem>>, vector<8x16xf32>
    %cst = arith.constant dense<0.000000e+00> : vector<8x64xf32>
    %11 = tpu.matmul %10, %0, %cst {dimension_numbers = #tpu.dot_dimension_numbers<[1], [0], [0], [1], [0, 0, 1, 1], [], []>} : vector<8x16xf32>, vector<16x64xf32>, vector<8x64xf32> -> vector<8x64xf32>
    %c0_7 = arith.constant 0 : index
    %c0_8 = arith.constant 0 : index
    %12 = vector.load %arg1[%c0_7, %c0_8] : memref<8x24xf32, #tpu.memory_space<vmem>>, vector<8x24xf32>
    %cst_9 = arith.constant dense<0.000000e+00> : vector<8x64xf32>
    %13 = tpu.matmul %12, %1, %cst_9 {dimension_numbers = #tpu.dot_dimension_numbers<[1], [0], [0], [1], [0, 0, 1, 1], [], []>} : vector<8x24xf32>, vector<24x64xf32>, vector<8x64xf32> -> vector<8x64xf32>
    %14 = tpu.concatenate %11, %13 in 0 : vector<8x64xf32>, vector<8x64xf32> -> vector<16x64xf32>
    %15 = vector.extract_strided_slice %14 {offsets = [0, 0], sizes = [8, 64], strides = [1, 1]} : vector<16x64xf32> to vector<8x64xf32>
    %cst_10 = arith.constant dense<0.000000e+00> : vector<64xf32>
    %16 = vector.multi_reduction <add>, %15, %cst_10 [0] : vector<8x64xf32> to vector<64xf32>
    %17 = vector.shape_cast %16 : vector<64xf32> to vector<1x64xf32>
    %cst_11 = arith.constant 8.000000e+00 : f32
    %18 = vector.broadcast %cst_11 : f32 to vector<1x64xf32>
    %19 = arith.divf %17, %18 : vector<1x64xf32>
    %20 = arith.mulf %15, %15 : vector<8x64xf32>
    %cst_12 = arith.constant dense<0.000000e+00> : vector<64xf32>
    %21 = vector.multi_reduction <add>, %20, %cst_12 [0] : vector<8x64xf32> to vector<64xf32>
    %22 = vector.shape_cast %21 : vector<64xf32> to vector<1x64xf32>
    %cst_13 = arith.constant 8.000000e+00 : f32
    %23 = vector.broadcast %cst_13 : f32 to vector<1x64xf32>
    %24 = arith.divf %22, %23 : vector<1x64xf32>
    %25 = arith.mulf %19, %19 : vector<1x64xf32>
    %26 = arith.subf %24, %25 : vector<1x64xf32>
    %cst_14 = arith.constant 9.99999974E-6 : f32
    %27 = vector.broadcast %cst_14 : f32 to vector<1x64xf32>
    %28 = arith.addf %26, %27 : vector<1x64xf32>
    %29 = math.rsqrt %28 : vector<1x64xf32>
    %30 = arith.mulf %6, %29 : vector<1x64xf32>
    %31 = vector.broadcast %30 : vector<1x64xf32> to vector<8x64xf32>
    %32 = arith.mulf %15, %31 : vector<8x64xf32>
    %33 = arith.mulf %30, %19 : vector<1x64xf32>
    %34 = arith.subf %7, %33 : vector<1x64xf32>
    %35 = vector.broadcast %34 : vector<1x64xf32> to vector<8x64xf32>
    %36 = arith.addf %32, %35 : vector<8x64xf32>
    %37 = vector.extract_strided_slice %14 {offsets = [8, 0], sizes = [8, 64], strides = [1, 1]} : vector<16x64xf32> to vector<8x64xf32>
    %cst_15 = arith.constant dense<0.000000e+00> : vector<64xf32>
    %38 = vector.multi_reduction <add>, %37, %cst_15 [0] : vector<8x64xf32> to vector<64xf32>
    %39 = vector.shape_cast %38 : vector<64xf32> to vector<1x64xf32>
    %cst_16 = arith.constant 8.000000e+00 : f32
    %40 = vector.broadcast %cst_16 : f32 to vector<1x64xf32>
    %41 = arith.divf %39, %40 : vector<1x64xf32>
    %42 = arith.mulf %37, %37 : vector<8x64xf32>
    %cst_17 = arith.constant dense<0.000000e+00> : vector<64xf32>
    %43 = vector.multi_reduction <add>, %42, %cst_17 [0] : vector<8x64xf32> to vector<64xf32>
    %44 = vector.shape_cast %43 : vector<64xf32> to vector<1x64xf32>
    %cst_18 = arith.constant 8.000000e+00 : f32
    %45 = vector.broadcast %cst_18 : f32 to vector<1x64xf32>
    %46 = arith.divf %44, %45 : vector<1x64xf32>
    %47 = arith.mulf %41, %41 : vector<1x64xf32>
    %48 = arith.subf %46, %47 : vector<1x64xf32>
    %cst_19 = arith.constant 9.99999974E-6 : f32
    %49 = vector.broadcast %cst_19 : f32 to vector<1x64xf32>
    %50 = arith.addf %48, %49 : vector<1x64xf32>
    %51 = math.rsqrt %50 : vector<1x64xf32>
    %52 = arith.mulf %6, %51 : vector<1x64xf32>
    %53 = vector.broadcast %52 : vector<1x64xf32> to vector<8x64xf32>
    %54 = arith.mulf %37, %53 : vector<8x64xf32>
    %55 = arith.mulf %52, %41 : vector<1x64xf32>
    %56 = arith.subf %7, %55 : vector<1x64xf32>
    %57 = vector.broadcast %56 : vector<1x64xf32> to vector<8x64xf32>
    %58 = arith.addf %54, %57 : vector<8x64xf32>
    %59 = tpu.concatenate %36, %58 in 0 : vector<8x64xf32>, vector<8x64xf32> -> vector<16x64xf32>
    %cst_20 = arith.constant 0.000000e+00 : f32
    %60 = vector.broadcast %cst_20 : f32 to vector<16x64xf32>
    %61 = arith.maximumf %59, %60 : vector<16x64xf32>
    %cst_21 = arith.constant dense<0.000000e+00> : vector<16x64xf32>
    %62 = tpu.matmul %61, %2, %cst_21 {dimension_numbers = #tpu.dot_dimension_numbers<[1], [0], [0], [1], [0, 0, 1, 1], [], []>} : vector<16x64xf32>, vector<64x64xf32>, vector<16x64xf32> -> vector<16x64xf32>
    %63 = vector.extract_strided_slice %62 {offsets = [0, 0], sizes = [8, 64], strides = [1, 1]} : vector<16x64xf32> to vector<8x64xf32>
    %cst_22 = arith.constant dense<0.000000e+00> : vector<64xf32>
    %64 = vector.multi_reduction <add>, %63, %cst_22 [0] : vector<8x64xf32> to vector<64xf32>
    %65 = vector.shape_cast %64 : vector<64xf32> to vector<1x64xf32>
    %cst_23 = arith.constant 8.000000e+00 : f32
    %66 = vector.broadcast %cst_23 : f32 to vector<1x64xf32>
    %67 = arith.divf %65, %66 : vector<1x64xf32>
    %68 = arith.mulf %63, %63 : vector<8x64xf32>
    %cst_24 = arith.constant dense<0.000000e+00> : vector<64xf32>
    %69 = vector.multi_reduction <add>, %68, %cst_24 [0] : vector<8x64xf32> to vector<64xf32>
    %70 = vector.shape_cast %69 : vector<64xf32> to vector<1x64xf32>
    %cst_25 = arith.constant 8.000000e+00 : f32
    %71 = vector.broadcast %cst_25 : f32 to vector<1x64xf32>
    %72 = arith.divf %70, %71 : vector<1x64xf32>
    %73 = arith.mulf %67, %67 : vector<1x64xf32>
    %74 = arith.subf %72, %73 : vector<1x64xf32>
    %cst_26 = arith.constant 9.99999974E-6 : f32
    %75 = vector.broadcast %cst_26 : f32 to vector<1x64xf32>
    %76 = arith.addf %74, %75 : vector<1x64xf32>
    %77 = math.rsqrt %76 : vector<1x64xf32>
    %78 = arith.mulf %8, %77 : vector<1x64xf32>
    %79 = vector.broadcast %78 : vector<1x64xf32> to vector<8x64xf32>
    %80 = arith.mulf %63, %79 : vector<8x64xf32>
    %81 = arith.mulf %78, %67 : vector<1x64xf32>
    %82 = arith.subf %9, %81 : vector<1x64xf32>
    %83 = vector.broadcast %82 : vector<1x64xf32> to vector<8x64xf32>
    %84 = arith.addf %80, %83 : vector<8x64xf32>
    %85 = vector.extract_strided_slice %62 {offsets = [8, 0], sizes = [8, 64], strides = [1, 1]} : vector<16x64xf32> to vector<8x64xf32>
    %cst_27 = arith.constant dense<0.000000e+00> : vector<64xf32>
    %86 = vector.multi_reduction <add>, %85, %cst_27 [0] : vector<8x64xf32> to vector<64xf32>
    %87 = vector.shape_cast %86 : vector<64xf32> to vector<1x64xf32>
    %cst_28 = arith.constant 8.000000e+00 : f32
    %88 = vector.broadcast %cst_28 : f32 to vector<1x64xf32>
    %89 = arith.divf %87, %88 : vector<1x64xf32>
    %90 = arith.mulf %85, %85 : vector<8x64xf32>
    %cst_29 = arith.constant dense<0.000000e+00> : vector<64xf32>
    %91 = vector.multi_reduction <add>, %90, %cst_29 [0] : vector<8x64xf32> to vector<64xf32>
    %92 = vector.shape_cast %91 : vector<64xf32> to vector<1x64xf32>
    %cst_30 = arith.constant 8.000000e+00 : f32
    %93 = vector.broadcast %cst_30 : f32 to vector<1x64xf32>
    %94 = arith.divf %92, %93 : vector<1x64xf32>
    %95 = arith.mulf %89, %89 : vector<1x64xf32>
    %96 = arith.subf %94, %95 : vector<1x64xf32>
    %cst_31 = arith.constant 9.99999974E-6 : f32
    %97 = vector.broadcast %cst_31 : f32 to vector<1x64xf32>
    %98 = arith.addf %96, %97 : vector<1x64xf32>
    %99 = math.rsqrt %98 : vector<1x64xf32>
    %100 = arith.mulf %8, %99 : vector<1x64xf32>
    %101 = vector.broadcast %100 : vector<1x64xf32> to vector<8x64xf32>
    %102 = arith.mulf %85, %101 : vector<8x64xf32>
    %103 = arith.mulf %100, %89 : vector<1x64xf32>
    %104 = arith.subf %9, %103 : vector<1x64xf32>
    %105 = vector.broadcast %104 : vector<1x64xf32> to vector<8x64xf32>
    %106 = arith.addf %102, %105 : vector<8x64xf32>
    %107 = tpu.concatenate %84, %106 in 0 : vector<8x64xf32>, vector<8x64xf32> -> vector<16x64xf32>
    %cst_32 = arith.constant 0.000000e+00 : f32
    %108 = vector.broadcast %cst_32 : f32 to vector<16x64xf32>
    %109 = arith.maximumf %107, %108 : vector<16x64xf32>
    %cst_33 = arith.constant dense<0.000000e+00> : vector<16x32xf32>
    %110 = tpu.matmul %109, %4, %cst_33 {dimension_numbers = #tpu.dot_dimension_numbers<[1], [0], [0], [1], [0, 0, 1, 1], [], []>} : vector<16x64xf32>, vector<64x32xf32>, vector<16x32xf32> -> vector<16x32xf32>
    %c0_34 = arith.constant 0 : index
    %c0_35 = arith.constant 0 : index
    %111 = vector.load %arg3[%c0_34, %c0_35] : memref<16x32xf32, #tpu.memory_space<vmem>>, vector<16x32xf32>
    tpu.vector_store %arg3[%c0_34, %c0_35], %110 {strides = array<i32>} : memref<16x32xf32, #tpu.memory_space<vmem>>, vector<16x32xf32>,
    return
  }
}

</mosaic_0001>

<bundles_post_ra>
// kernel: tpu_custom_call.1
= control target key start
LH: loop header
LB: loop body
LE: loop exit
PB: predicated region body
PF: predicated region fallthrough
CT: control target
= control target key end

     0   :  { %v685_v3 = vmov 0.0|0.0   ;;  %vm686_vm0 = vmmov 0   ;;  %v687_v7 = vmov 0.0   ;;  %s823_s0 = inlined_call_operand.vmem [shape: f32[8,16], index: 0, kind: input, shape index: {}]   ;;  %s824_s1 = inlined_call_operand.vmem [shape: f32[8,24], index: 1, kind: input, shape index: {}]   ;;  %s825_s2 = inlined_call_operand.vmem [shape: f32[176,64], index: 2, kind: input, shape index: {}]   ;;  %s826_s3 = inlined_call_operand.hbm [shape: f32[16,32], index: 3, kind: output, shape index: {}]  }
   0x1   :  { %v15_v0 = vld [vmem:[%s825_s2] sm:$0xff]  ;;  %v16_v1 = vld [vmem:[%s825_s2 + $0x8] sm:$0xff]  ;;  %v17_v2 = vld [vmem:[%s825_s2 + $0x10] sm:$0xff]  ;;  %609 = vmatprep.subr.bf16.mxu0 %v685_v3  ;;  %612 = vmatprep.subr.bf16.mxu1 %v685_v3 }
   0x2   :  { %v610_v4 = vpack.c.bf16 %v16_v1, %v15_v0  ;;  %v18_v5 = vld [vmem:[%s825_s2 + $0x18] sm:$0xff]  ;;  %559 = vmatprep.mubr.msk.f32.mxu0 %vm686_vm0, %v687_v7  ;;  %568 = vmatprep.mubr.msk.f32.mxu1 %vm686_vm0, %v687_v7 }
   0x3   :  { %v613_v6 = vpack.c.bf16 %v18_v5, %v17_v2 }
   0x4   :  { %8 = vsyncpa [#allocation3], 0  ;;  %611 = vmatpush3.bf16.msra.mxu0 %v610_v4  ;;  %v37_v8 = vld [vmem:[%s823_s0] sm:$0xff]  ;;  %vm38_vm1 = vcmask 130048   ;;  %vm113_vm2 = vcmask 195584   ;;  %v20_v11 = vld [vmem:[%s825_s2 + $0x28] sm:$0xff]  ;;  %v211_v3 = vlaneseq }
   0x5   :  { %614 = vmatpush3.bf16.msra.mxu1 %v613_v6  ;;  %v19_v9 = vld [vmem:[%s825_s2 + $0x20] sm:$0xff]  ;;  %v21_v12 = vld [vmem:[%s825_s2 + $0x30] sm:$0xff]  ;;  %v22_v14 = vld [vmem:[%s825_s2 + $0x38] sm:$0xff]  ;;  %vm187_vm3 = vcmask 523264   ;;  %vm503_vm4 = vcmask 261120  }
   0x6   :  { %566 = vmatprep.subr.mxu1 %v687_v7  ;;  %v112_v10 = vld [vmem:[%s824_s1] sm:$0xff]  ;;  %v615_v13 = vpack.c.bf16 %v21_v12, %v20_v11  ;;  %v24_v17 = vld [vmem:[%s825_s2 + $0x48] sm:$0xff]  ;;  %v25_v18 = vld [vmem:[%s825_s2 + $0x50] sm:$0xff]  ;;  %v760_v4 = vshrl.u32 %v211_v3, 7 }
   0x7   :  { %560 = vmatmul.mubr.msk.f32.vlgmr.msra.gmra.mrb[0].mxu0 %vm38_vm1, %v37_v8  ;;  %v23_v15 = vld [vmem:[%s825_s2 + $0x40] sm:$0xff]  ;;  %v623_v19 = vpack.c.bf16 %v25_v18, %v24_v17  ;;  %v26_v20 = vld [vmem:[%s825_s2 + $0x58] sm:$0xff]  ;;  %v765_v5 = vld [vmem:[%s825_s2 + $0xa8] sm:$0xf] }
   0x8   :  { %616 = vmatprep.subr.bf16.mxu0 %v615_v13  ;;  %v619_v16 = vpack.c.bf16 %v23_v15, %v22_v14  ;;  %v27_v21 = vld [vmem:[%s825_s2 + $0x60] sm:$0xff]  ;;  %v213_v8 = vsub.s32 0, %v760_v4  ;;  %v223_v14 = vsub.s32 1, %v760_v4 }
   0x9   :  { %567 = vmatpush3.msra.mxu1 %v19_v9  ;;  %618 = vmatpush3.bf16.msra.mxu0 %v615_v13  ;;  %v627_v22 = vpack.c.bf16 %v27_v21, %v26_v20 }
   0xa   :  { %569 = vmatmul.mubr.msk.f32.vlgmr.msra.gmra.mrb[0].mxu1 %vm113_vm2, %v112_v10  ;;  %620 = vmatprep.subr.bf16.mxu0 %v619_v16 }
   0xd   :  { %622 = vmatpush3.bf16.msra.mxu0 %v619_v16 }
   0xe   :  { %624 = vmatprep.subr.bf16.mxu0 %v623_v19 }
  0x11   :  { %626 = vmatpush3.bf16.msra.mxu0 %v623_v19 }
  0x12   :  { %628 = vmatprep.subr.bf16.mxu0 %v627_v22 }
  0x15   :  { %630 = vmatpush3.bf16.msra.mxu0 %v627_v22 }
  0xda   :  { %v108_v23 = vpop.f32.mrb[0].mxu0 }
  0xdb   :  { %v188_v24 = vsel %vm187_vm3, %v108_v23, 0.0  ;;  %v197_v25 = vmul.f32 %v108_v23, %v108_v23  ;;  %v561_v26 = vpop.f32.mrb[1].mxu0 }
  0xdc   :  { %v189_v27 = vrot.slane %v188_v24, 4 }
  0xdd   :  { %v198_v28 = vsel %vm187_vm3, %v197_v25, 0.0  ;;  %v183_v29 = vpop.f32.mrb[0].mxu1 }
  0xde   :  { %v190_v30 = vadd.f32 %v189_v27, %v188_v24  ;;  %v199_v31 = vrot.slane %v198_v28, 4  ;;  %v226_v32 = vsel %vm187_vm3, %v183_v29, 0.0  ;;  %v234_v33 = vmul.f32 %v183_v29, %v183_v29  ;;  %v570_v34 = vpop.f32.mrb[1].mxu1 }
  0xdf   :  { %v227_v35 = vrot.slane %v226_v32, 4  ;;  %v32_v34 = vld [vmem:[%s825_s2 + $0x88] sm:$0xff] }
  0xe0   :  { %v191_v36 = vrot.slane %v190_v30, 2  ;;  %v200_v37 = vadd.f32 %v199_v31, %v198_v28  ;;  %v235_v38 = vsel %vm187_vm3, %v234_v33, 0.0 }
  0xe1   :  { %v228_v39 = vadd.f32 %v227_v35, %v226_v32  ;;  %v236_v40 = vrot.slane %v235_v38, 4  ;;  %v31_v32 = vld [vmem:[%s825_s2 + $0x80] sm:$0xff]  ;;  %v33_v35 = vld [vmem:[%s825_s2 + $0x90] sm:$0xff] }
  0xe2   :  { %v192_v41 = vadd.f32 %v191_v36, %v190_v30  ;;  %v201_v42 = vrot.slane %v200_v37, 2  ;;  %v28_v30 = vld [vmem:[%s825_s2 + $0x68] sm:$0xff]  ;;  %v639_v36 = vpack.c.bf16 %v33_v35, %v32_v34 }
  0xe3   :  { %v229_v43 = vrot.slane %v228_v39, 2  ;;  %v237_v44 = vadd.f32 %v236_v40, %v235_v38  ;;  %v35_v38 = vld [vmem:[%s825_s2 + $0xa0] sm:$0xff] }
  0xe4   :  { %v193_v45 = vrot.slane %v192_v41, 1  ;;  %v202_v46 = vadd.f32 %v201_v42, %v200_v37  ;;  %v34_v37 = vld [vmem:[%s825_s2 + $0x98] sm:$0xff] }
  0xe5   :  { %v230_v47 = vadd.f32 %v229_v43, %v228_v39  ;;  %v238_v48 = vrot.slane %v237_v44, 2  ;;  %v643_v39 = vpack.c.bf16 %v35_v38, %v34_v37 }
  0xe6   :  { %v194_v49 = vadd.f32 %v193_v45, %v192_v41  ;;  %v203_v50 = vrot.slane %v202_v46, 1 }
  0xe7   :  { %v231_v51 = vrot.slane %v230_v47, 1  ;;  %v239_v52 = vadd.f32 %v238_v48, %v237_v44 }
  0xe8   :  { %v196_v53 = vmul.f32 0.125, %v194_v49  ;;  %v204_v54 = vadd.f32 %v203_v50, %v202_v46 }
  0xe9   :  { %v232_v55 = vadd.f32 %v231_v51, %v230_v47  ;;  %v240_v56 = vrot.slane %v239_v52, 1 }
  0xea   :  { %v205_v57 = vmul.f32 0.125, %v204_v54  ;;  %v206_v58 = vmul.f32 %v196_v53, %v196_v53 }
  0xeb   :  { %v233_v59 = vmul.f32 0.125, %v232_v55  ;;  %v241_v60 = vadd.f32 %v240_v56, %v239_v52 }
  0xec   :  { %v207_v61 = vsub.f32 %v205_v57, %v206_v58 }
  0xed   :  { %v242_v62 = vmul.f32 0.125, %v241_v60  ;;  %v243_v63 = vmul.f32 %v233_v59, %v233_v59 }
  0xee   :  { %v208_v0 = vadd.f32 1e-05, %v207_v61 }
  0xef   :  { %v244_v1 = vsub.f32 %v242_v62, %v243_v63 }
  0xf0   :  { %653 = vrsqrt.f32 %v208_v0 }
  0xf1   :  { %v245_v2 = vadd.f32 1e-05, %v244_v1 }
  0xf3   :  { %655 = vrsqrt.f32 %v245_v2 }
  0xfa   :  { %v654_v6 = vpop.eup %653 }
  0xfb   :  { %v210_v7 = vmul.f32 %v654_v6, %v765_v5 }
  0xfd   :  { %v656_v9 = vpop.eup %655  ;;  %v216_v10 = vmul.f32 %v210_v7, %v196_v53  ;;  %v214_v12 = vrot.slane %v210_v7, %v213_v8 }
  0xfe   :  { %v247_v11 = vmul.f32 %v656_v9, %v765_v5 }
  0xff   :  { %v218_v13 = vrot.slane %v216_v10, 7  ;;  %v215_v19 = vmul.f32 %v214_v12, %v108_v23  ;;  %v29_v23 = vld [vmem:[%s825_s2 + $0x70] sm:$0xff] }
 0x100   :  { %v253_v15 = vmul.f32 %v247_v11, %v233_v59  ;;  %v251_v17 = vrot.slane %v247_v11, %v213_v8  ;;  %v631_v31 = vpack.c.bf16 %v29_v23, %v28_v30 }
 0x101   :  { %v220_v16 = vsub.f32 %v765_v5, %v218_v13 }
 0x102   :  { %v255_v18 = vrot.slane %v253_v15, 7  ;;  %v252_v24 = vmul.f32 %v251_v17, %v183_v29  ;;  %632 = vmatprep.subr.bf16.mxu1 %v631_v31  ;;  %v30_v29 = vld [vmem:[%s825_s2 + $0x78] sm:$0xff]  ;;  %s688_s2 = smov [#allocation2]  }
 0x103   :  { %v224_v20 = vrot.slane %v220_v16, %v223_v14  ;;  %634 = vmatpush3.bf16.msra.mxu1 %v631_v31  ;;  %v635_v33 = vpack.c.bf16 %v31_v32, %v30_v29  ;;  %s511_s30 = sshll.u32 %s688_s2, 4  ;;  %s512_s30 = int_to_ptr.vmem [resolvable:$true] %s511_s30 }
 0x104   :  { %v257_v21 = vsub.f32 %v765_v5, %v255_v18  ;;  %s661_s4 = scalar_lea.vmem %s512_s30, 256  ;;  %p666_p1 = scmp.lt.s32.totalorder %s512_s30, %s512_s30 }
 0x105   :  { %v225_v22 = vadd.f32 %v224_v20, %v215_v19  ;;  %636 = vmatprep.subr.bf16.mxu1 %v635_v33  ;;  %p662_p0 = scmp.ne.s32.totalorder %s512_s30, %s661_s4  ;;  %p667_p2 = scmp.lt.s32.totalorder %s661_s4, %s661_s4 }
 0x106   :  { %v261_v25 = vrot.slane %v257_v21, %v223_v14 }
 0x107   :  { %v263_v26 = vmax.f32 %v225_v22, 0.0  ;;  %638 = vmatpush3.bf16.msra.mxu1 %v635_v33  ;;  %v370_v22 = vsub.s32 2, %v760_v4  ;;  %p668_p3 = por %p667_p2, %p666_p1 }
 0x108   :  { %v262_v27 = vadd.f32 %v261_v25, %v252_v24  ;;  %640 = vmatprep.subr.bf16.mxu1 %v639_v36 }
 0x109   :  { %587 = vmatprep.mubr.msk.f32.mxu0 %vm187_vm3, %v263_v26  ;;  %p669_p4 = pnand %p668_p3, %p662_p0 }
 0x10a   :  { %v264_v28 = vmax.f32 %v262_v27, 0.0 }
 0x10b   :  { %642 = vmatpush3.bf16.msra.mxu1 %v639_v36 }
 0x10c   :  { %588 = vmatmul.mubr.msk.f32.vlgmr.msra.gmra.mrb[2].mxu0 %vm187_vm3, %v264_v28  ;;  %644 = vmatprep.subr.bf16.mxu1 %v643_v39  ;;  %v380_v28 = vsub.s32 3, %v760_v4 }
 0x10f   :  { %646 = vmatpush3.bf16.msra.mxu1 %v643_v39 }
 0x1df   :  { %v589_v40 = vpop.f32.mrb[2].mxu0 }
 0x1e0   :  { %v383_v41 = vsel %vm187_vm3, %v589_v40, 0.0  ;;  %v391_v42 = vmul.f32 %v589_v40, %v589_v40  ;;  %v337_v43 = vpop.f32.mrb[3].mxu0 }
 0x1e1   :  { %v384_v44 = vrot.slane %v383_v41, 4  ;;  %v346_v45 = vsel %vm187_vm3, %v337_v43, 0.0  ;;  %v354_v46 = vmul.f32 %v337_v43, %v337_v43 }
 0x1e2   :  { %v392_v47 = vsel %vm187_vm3, %v391_v42, 0.0  ;;  %v347_v48 = vrot.slane %v346_v45, 4 }
 0x1e3   :  { %v385_v49 = vadd.f32 %v384_v44, %v383_v41  ;;  %v393_v50 = vrot.slane %v392_v47, 4  ;;  %v355_v51 = vsel %vm187_vm3, %v354_v46, 0.0 }
 0x1e4   :  { %v348_v52 = vadd.f32 %v347_v48, %v346_v45  ;;  %v356_v53 = vrot.slane %v355_v51, 4 }
 0x1e5   :  { %v386_v54 = vrot.slane %v385_v49, 2  ;;  %v394_v55 = vadd.f32 %v393_v50, %v392_v47 }
 0x1e6   :  { %v349_v56 = vrot.slane %v348_v52, 2  ;;  %v357_v57 = vadd.f32 %v356_v53, %v355_v51 }
 0x1e7   :  { %v387_v58 = vadd.f32 %v386_v54, %v385_v49  ;;  %v395_v59 = vrot.slane %v394_v55, 2 }
 0x1e8   :  { %v350_v60 = vadd.f32 %v349_v56, %v348_v52  ;;  %v358_v61 = vrot.slane %v357_v57, 2 }
 0x1e9   :  { %v388_v62 = vrot.slane %v387_v58, 1  ;;  %v396_v63 = vadd.f32 %v395_v59, %v394_v55 }
 0x1ea   :  { %v351_v0 = vrot.slane %v350_v60, 1  ;;  %v359_v1 = vadd.f32 %v358_v61, %v357_v57 }
 0x1eb   :  { %v389_v2 = vadd.f32 %v388_v62, %v387_v58  ;;  %v397_v3 = vrot.slane %v396_v63, 1 }
 0x1ec   :  { %v352_v6 = vadd.f32 %v351_v0, %v350_v60  ;;  %v360_v7 = vrot.slane %v359_v1, 1 }
 0x1ed   :  { %v390_v8 = vmul.f32 0.125, %v389_v2  ;;  %v398_v9 = vadd.f32 %v397_v3, %v396_v63 }
 0x1ee   :  { %v353_v10 = vmul.f32 0.125, %v352_v6  ;;  %v361_v11 = vadd.f32 %v360_v7, %v359_v1 }
 0x1ef   :  { %v399_v12 = vmul.f32 0.125, %v398_v9  ;;  %v400_v13 = vmul.f32 %v390_v8, %v390_v8 }
 0x1f0   :  { %v362_v14 = vmul.f32 0.125, %v361_v11  ;;  %v363_v15 = vmul.f32 %v353_v10, %v353_v10 }
 0x1f1   :  { %v401_v16 = vsub.f32 %v399_v12, %v400_v13 }
 0x1f2   :  { %v364_v17 = vsub.f32 %v362_v14, %v363_v15 }
 0x1f3   :  { %v402_v18 = vadd.f32 1e-05, %v401_v16 }
 0x1f4   :  { %v365_v19 = vadd.f32 1e-05, %v364_v17 }
 0x1f5   :  { %657 = vrsqrt.f32 %v402_v18 }
 0x1f6   :  { %659 = vrsqrt.f32 %v365_v19 }
 0x1ff   :  { %v658_v20 = vpop.eup %657 }
 0x200   :  { %v660_v21 = vpop.eup %659  ;;  %v404_v24 = vmul.f32 %v658_v20, %v765_v5 }
 0x201   :  { %v367_v25 = vmul.f32 %v660_v21, %v765_v5 }
 0x202   :  { %v410_v26 = vmul.f32 %v404_v24, %v390_v8  ;;  %v408_v30 = vrot.slane %v404_v24, %v370_v22 }
 0x203   :  { %v373_v27 = vmul.f32 %v367_v25, %v353_v10  ;;  %v371_v31 = vrot.slane %v367_v25, %v370_v22 }
 0x204   :  { %v412_v23 = vrot.slane %v410_v26, 7  ;;  %v409_v34 = vmul.f32 %v589_v40, %v408_v30 }
 0x205   :  { %v375_v29 = vrot.slane %v373_v27, 7  ;;  %v372_v36 = vmul.f32 %v371_v31, %v337_v43 }
 0x206   :  { %v414_v32 = vsub.f32 %v765_v5, %v412_v23 }
 0x207   :  { %v377_v33 = vsub.f32 %v765_v5, %v375_v29 }
 0x208   :  { %v418_v35 = vrot.slane %v414_v32, %v380_v28 }
 0x209   :  { %v381_v37 = vrot.slane %v377_v33, %v380_v28 }
 0x20a   :  { %v419_v38 = vadd.f32 %v418_v35, %v409_v34 }
 0x20b   :  { %v382_v39 = vadd.f32 %v381_v37, %v372_v36 }
 0x20c   :  { %v421_v42 = vmax.f32 %v419_v38, 0.0 }
 0x20d   :  { %v420_v41 = vmax.f32 %v382_v39, 0.0 }
 0x20f   :  { %606 = vmatprep.mubr.msk.f32.mxu1 %vm187_vm3, %v420_v41 }
 0x210   :  { %607 = vmatmul.mubr.msk.f32.vlgmr.msra.gmra.mrb[2].mxu1 %vm187_vm3, %v421_v42 }
 0x2e3   :  { %v608_v4 = vpop.f32.mrb[2].mxu1 }
 0x2e4   :  { %505 = vst.msk [vmem:[#allocation2 + $0x8] sm:$0xff] %vm503_vm4, %v608_v4  ;;  %v494_v44 = vpop.f32.mrb[3].mxu1 }
 0x2e5   :  { %504 = vst.msk [vmem:[#allocation2] sm:$0xff] %vm503_vm4, %v494_v44 }
 0x2e6   :  { %672 = shalt.err (!%p669_p4)
}
 0x2e7   :  { %s673_s6 = scalar_lea.hbm %s826_s3, 256 }
 0x2e8   :  { %p674_p5 = scmp.ne.s32.totalorder %s826_s3, %s673_s6  ;;  %p677_p6 = scmp.lt.u32.totalorder %s673_s6, %s826_s3 }
 0x2ea   :  { %p679_p7 = pnand %p677_p6, %p674_p5 }
 0x2ec   :  { %682 = shalt.err (!%p679_p7)
}
 0x2ed   :  { %s689_s11 = smov 128   ;;  %s690_s12 = smov 8  }
 0x2ee   :  { %517 = dma.vmem_to_hbm [thread:$0]  %s512_s30, 256, %s826_s3, [#allocation3], %s689_s11, %s689_s11, %s690_s12  }
 0x2ef   :  { %683 = dma.done.wait [#allocation3], 256  }
 0x2f0   :  { %684 = vsyncadd [#allocation3], 4294967040 }
 0x2f1   :  { %521 = vsyncpa [#allocation3], 1 }

</bundles_post_ra>
